<compile_context>
chip_gen: v6e
topology: v6e:2x2x1
jax: 0.10.0
libtpu: 0.0.40
codegen_flags: <defaults>
</compile_context>

<pallas_src>
import jax
import jax.numpy as jnp
from jax.experimental import pallas as pl
from jax.experimental.pallas import tpu as pltpu

LN_EPS = 1e-5  # nn.LayerNorm default


def _round_up(n, m):
    return ((n + m - 1) // m) * m


def _cdiv(a, b):
    return (a + b - 1) // b


def _vmem_capacity_bytes():
    try:
        return int(pltpu.get_tpu_info().vmem_capacity_bytes)
    except Exception:  # query unavailable at trace time -> conservative default
        return 128 << 20


def _vmem_need(tm, D, Hc, h_tiled, mm_bytes, out_bytes):
    """Rough VMEM footprint (bytes) of one grid step's working set."""
    wbuf = 2 if h_tiled else 1                  # streamed (double) vs resident (single)
    weights = wbuf * 2 * D * Hc * mm_bytes      # w1 chunk + w2 chunk
    x_tiles = 2 * tm * D * 4                    # f32 x tile, double-buffered
    out_tiles = 2 * tm * D * out_bytes          # output tile, double-buffered
    params = 2 * (Hc + 3 * D) * 4               # b1 chunk, b2, gamma, beta
    acc = tm * D * 4                            # f32 accumulator scratch
    temps = tm * (Hc + 2 * D) * 4               # h / y / normalized f32 temporaries
    return weights + x_tiles + out_tiles + params + acc + temps


def ffn0_kernel(x_ref, w1_ref, b1_ref, w2_ref, b2_ref, g_ref, beta_ref,
                o_ref, acc_ref):
    k = pl.program_id(1)

    @pl.when(k == 0)
    def _():
        acc_ref[...] = jnp.zeros_like(acc_ref)

    # --- lr1 + ReLU: cast x to the matmul dtype in-kernel (no wrapper pass) ---
    x = x_ref[...].astype(w1_ref.dtype)
    h = jnp.dot(x, w1_ref[...], preferred_element_type=jnp.float32)
    h = jnp.maximum(h + b1_ref[...], 0.0)

    # --- lr2, accumulated over H chunks in f32 ---
    acc_ref[...] += jnp.dot(h.astype(w2_ref.dtype), w2_ref[...],
                            preferred_element_type=jnp.float32)

    @pl.when(k == pl.num_programs(1) - 1)
    def _():
        y = acc_ref[...] + b2_ref[...]
        # LayerNorm over last dim (two-pass variance, matches reference form).
        d_inv = 1.0 / y.shape[-1]
        mean = jnp.sum(y, axis=-1, keepdims=True) * d_inv
        yc = y - mean
        var = jnp.sum(yc * yc, axis=-1, keepdims=True) * d_inv
        out = yc * jax.lax.rsqrt(var + LN_EPS) * g_ref[...] + beta_ref[...]
        # Dropout(p=0.2) -> identity (eval/inference semantics).
        o_ref[...] = out.astype(o_ref.dtype)


def ffn0_forward(x, w1, b1, w2, b2, gamma, beta, *,
                 tm_max=512, h_chunk=None,
                 matmul_dtype=jnp.bfloat16, out_dtype=jnp.float32):
    """x: [N, D]. w1: [D, H], w2: [H, D]. Returns [N, D] in out_dtype."""
    N, D = x.shape
    H = w1.shape[1]
    mm_bytes = jnp.dtype(matmul_dtype).itemsize
    out_bytes = jnp.dtype(out_dtype).itemsize

    vmem_cap = _vmem_capacity_bytes()
    budget = int(vmem_cap * 0.65)  # headroom for Mosaic scratch / semaphores

    # --- H chunk: only tile H when resident weights would blow the budget ---
    if h_chunk is not None:
        Hc = int(h_chunk)
        if Hc != H and (H % Hc != 0 or Hc % 128 != 0):
            raise ValueError("h_chunk must divide H and be a multiple of 128")
    else:
        Hc = H
        # Halving keeps divisibility of H; floor at 512 and lane multiples of 128.
        while (_vmem_need(64, D, Hc, Hc < H, mm_bytes, out_bytes) > budget
               and Hc % 2 == 0 and (Hc // 2) % 128 == 0 and Hc // 2 >= 512):
            Hc //= 2
    h_tiled = Hc < H
    h_blocks = H // Hc

    # --- row tile tm: multiple of 8, as large as the budget allows ---
    tm_cap = _round_up(N, 8)
    if N > 8:
        # Keep >= 2 row-grid steps so v7x megacore can split the parallel axis.
        tm_cap = min(tm_cap, _round_up(_cdiv(N, 2), 8))
    cands, c = [], min(_round_up(tm_max, 8), tm_cap)
    while c >= 8:
        cands.append(c)
        if c == 8:
            break
        c = max(8, _round_up(c // 2, 8))
    tm = 8
    for c in cands:
        if _vmem_need(c, D, Hc, h_tiled, mm_bytes, out_bytes) <= budget:
            tm = c
            break
    n_blocks = _cdiv(N, tm)

    # --- per-call prep (weight casts are no-ops when params are pre-cast) ---
    w1_mm = w1 if w1.dtype == matmul_dtype else w1.astype(matmul_dtype)
    w2_mm = w2 if w2.dtype == matmul_dtype else w2.astype(matmul_dtype)
    b1_2d = b1.reshape(1, H).astype(jnp.float32)
    b2_2d = b2.reshape(1, D).astype(jnp.float32)
    g_2d = gamma.reshape(1, D).astype(jnp.float32)
    beta_2d = beta.reshape(1, D).astype(jnp.float32)

    # --- block specs ---
    if h_tiled:
        # Weights streamed per H chunk; default double-buffering hides the DMA.
        w1_spec = pl.BlockSpec((D, Hc), lambda i, k: (0, k))
        w2_spec = pl.BlockSpec((Hc, D), lambda i, k: (k, 0))
    else:
        # Grid-invariant weights: resident, single-buffered.
        w1_spec = pl.BlockSpec((D, Hc), lambda i, k: (0, 0),
                               pipeline_mode=pl.Buffered(1))
        w2_spec = pl.BlockSpec((Hc, D), lambda i, k: (0, 0),
                               pipeline_mode=pl.Buffered(1))

    need = _vmem_need(tm, D, Hc, h_tiled, mm_bytes, out_bytes)
    vmem_limit = int(min(max(int(need * 1.25), 16 << 20) + (4 << 20),
                         int(vmem_cap * 0.85)))

    out = pl.pallas_call(
        ffn0_kernel,
        out_shape=jax.ShapeDtypeStruct((N, D), out_dtype),
        grid_spec=pltpu.PrefetchScalarGridSpec(
            num_scalar_prefetch=0,
            grid=(n_blocks, h_blocks),
            in_specs=[
                pl.BlockSpec((tm, D), lambda i, k: (i, 0)),   # x row tile (f32)
                w1_spec,                                      # w1 [D, Hc]
                pl.BlockSpec((1, Hc), lambda i, k: (0, k)),   # b1 chunk
                w2_spec,                                      # w2 [Hc, D]
                pl.BlockSpec((1, D), lambda i, k: (0, 0)),    # b2
                pl.BlockSpec((1, D), lambda i, k: (0, 0)),    # gamma
                pl.BlockSpec((1, D), lambda i, k: (0, 0)),    # beta
            ],
            out_specs=pl.BlockSpec((tm, D), lambda i, k: (i, 0)),
            scratch_shapes=[pltpu.VMEM((tm, D), jnp.float32)],
        ),
        compiler_params=pltpu.CompilerParams(
            dimension_semantics=("parallel", "arbitrary"),
            vmem_limit_bytes=vmem_limit),
    )(x, w1_mm, b1_2d, w2_mm, b2_2d, g_2d, beta_2d)

    return out


def _ref_forward(x, w1, b1, w2, b2, gamma, beta):
    h = jnp.maximum(x @ w1 + b1, 0.0)
    y = h @ w2 + b2
    mean = jnp.mean(y, axis=-1, keepdims=True)
    var = jnp.mean((y - mean) ** 2, axis=-1, keepdims=True)
    return (y - mean) / jnp.sqrt(var + LN_EPS) * gamma + beta


if __name__ == "__main__":
    # Small shapes consistent with FFN0: batch=2, seq=8, state_size=128, fe=1.
    batch, seq, state_size, fe = 2, 8, 128, 1
    hidden = fe * state_size
    N = batch * seq

    key = jax.random.PRNGKey(0)
    kx, k1, k2, k3, k4 = jax.random.split(key, 5)
    x = jax.random.normal(kx, (batch, seq, state_size), dtype=jnp.float32)

    # Deterministic param init (mimics PyTorch Linear's U(-1/sqrt(fan_in), ...))
    bound1 = 1.0 / jnp.sqrt(state_size)
    w1 = jax.random.uniform(k1, (state_size, hidden), jnp.float32, -bound1, bound1)
    b1 = jax.random.uniform(k2, (hidden,), jnp.float32, -bound1, bound1)
    bound2 = 1.0 / jnp.sqrt(hidden)
    w2 = jax.random.uniform(k3, (hidden, state_size), jnp.float32, -bound2, bound2)
    b2 = jax.random.uniform(k4, (state_size,), jnp.float32, -bound2, bound2)
    gamma = jnp.ones((state_size,), jnp.float32)
    beta = jnp.zeros((state_size,), jnp.float32)

    x2d = x.reshape(N, state_size)
    ref = _ref_forward(x2d, w1, b1, w2, b2, gamma, beta)

    # 1) Exact path (f32 matmul operands) -- verifies fused kernel logic.
    out_f32 = ffn0_forward(x2d, w1, b1, w2, b2, gamma, beta,
                           matmul_dtype=jnp.float32)
    jax.block_until_ready(out_f32)
    assert jnp.allclose(out_f32, ref, atol=1e-4, rtol=1e-4), "f32-path mismatch"

    # 2) Fast path: weights pre-cast ONCE to bf16 (hoisted out of the call path).
    w1_bf16, w2_bf16 = w1.astype(jnp.bfloat16), w2.astype(jnp.bfloat16)
    out_bf16 = ffn0_forward(x2d, w1_bf16, b1, w2_bf16, b2, gamma, beta)
    jax.block_until_ready(out_bf16)
    assert jnp.allclose(out_bf16, ref, atol=5e-2, rtol=5e-2), "bf16-path mismatch"

    # 3) Ragged N (partial last row tile via cdiv grid + masked OOB writes).
    n_rag = 10
    out_rag = ffn0_forward(x2d[:n_rag], w1_bf16, b1, w2_bf16, b2, gamma, beta)
    jax.block_until_ready(out_rag)
    assert out_rag.shape == (n_rag, state_size)
    assert jnp.allclose(out_rag, ref[:n_rag], atol=5e-2, rtol=5e-2), "ragged mismatch"

    # 4) H-chunked (K-loop accumulator) path: fe=2 weights, forced h_chunk=128.
    hidden2 = 2 * state_size
    k5, k6 = jax.random.split(k4)
    w1b = jax.random.uniform(k5, (state_size, hidden2), jnp.float32, -bound1, bound1)
    b1b = jnp.zeros((hidden2,), jnp.float32)
    bound2b = 1.0 / jnp.sqrt(hidden2)
    w2b = jax.random.uniform(k6, (hidden2, state_size), jnp.float32, -bound2b, bound2b)
    ref2 = _ref_forward(x2d, w1b, b1b, w2b, b2, gamma, beta)
    out_chunked = ffn0_forward(x2d, w1b, b1b, w2b, b2, gamma, beta,
                               h_chunk=128, matmul_dtype=jnp.float32)
    jax.block_until_ready(out_chunked)
    assert jnp.allclose(out_chunked, ref2, atol=1e-4, rtol=1e-4), "H-chunk mismatch"

    print("KERNEL_OK")
</pallas_src>

<mosaic_0001>
module attributes {stable_mosaic.version = 11 : i64} {
  func.func @ffn0_kernel(%arg0: i32, %arg1: i32, %arg2: memref<8x128xf32, #tpu.memory_space<vmem>>, %arg3: memref<128x128xf32, #tpu.memory_space<vmem>>, %arg4: memref<1x128xf32, #tpu.memory_space<vmem>>, %arg5: memref<128x128xf32, #tpu.memory_space<vmem>>, %arg6: memref<1x128xf32, #tpu.memory_space<vmem>>, %arg7: memref<1x128xf32, #tpu.memory_space<vmem>>, %arg8: memref<1x128xf32, #tpu.memory_space<vmem>>, %arg9: memref<8x128xf32, #tpu.memory_space<vmem>>, %arg10: memref<8x128xf32, #tpu.memory_space<vmem>>) attributes {dimension_semantics = [#tpu.dimension_semantics<parallel>, #tpu.dimension_semantics<arbitrary>], iteration_bounds = array<i64: 2, 1>, scalar_prefetch = 0 : i64, scratch_operands = 1 : i64, tpu.core_type = #tpu.core_type<tc>, window_params = [{transform_indices = @transform_0, window_bounds = array<i64: 8, 128>}, {pipeline_mode = #tpu.pipeline_mode<synchronous>, transform_indices = @transform_1, window_bounds = array<i64: 128, 128>}, {transform_indices = @transform_2, window_bounds = array<i64: 1, 128>}, {pipeline_mode = #tpu.pipeline_mode<synchronous>, transform_indices = @transform_3, window_bounds = array<i64: 128, 128>}, {pipeline_mode = #tpu.pipeline_mode<synchronous>, transform_indices = @transform_4, window_bounds = array<i64: 1, 128>}, {pipeline_mode = #tpu.pipeline_mode<synchronous>, transform_indices = @transform_5, window_bounds = array<i64: 1, 128>}, {pipeline_mode = #tpu.pipeline_mode<synchronous>, transform_indices = @transform_6, window_bounds = array<i64: 1, 128>}, {transform_indices = @transform_7, window_bounds = array<i64: 8, 128>}]} {
    %c0_i32 = arith.constant 0 : i32
    %0 = arith.cmpi eq, %arg1, %c0_i32 : i32
    %1 = arith.extui %0 : i1 to i32
    %c0_i32_0 = arith.constant 0 : i32
    %2 = arith.cmpi ne, %1, %c0_i32_0 : i32
    scf.if %2 {
      %cst_16 = arith.constant 0.000000e+00 : f32
      %19 = vector.broadcast %cst_16 : f32 to vector<8x128xf32>
      %c0_17 = arith.constant 0 : index
      %c0_18 = arith.constant 0 : index
      %20 = vector.load %arg10[%c0_17, %c0_18] : memref<8x128xf32, #tpu.memory_space<vmem>>, vector<8x128xf32>
      tpu.vector_store %arg10[%c0_17, %c0_18], %19 {strides = array<i32>} : memref<8x128xf32, #tpu.memory_space<vmem>>, vector<8x128xf32>,
    } else {
    }
    %c0 = arith.constant 0 : index
    %c0_1 = arith.constant 0 : index
    %3 = vector.load %arg2[%c0, %c0_1] : memref<8x128xf32, #tpu.memory_space<vmem>>, vector<8x128xf32>
    %c0_2 = arith.constant 0 : index
    %c0_3 = arith.constant 0 : index
    %4 = vector.load %arg3[%c0_2, %c0_3] : memref<128x128xf32, #tpu.memory_space<vmem>>, vector<128x128xf32>
    %cst = arith.constant dense<0.000000e+00> : vector<8x128xf32>
    %5 = tpu.matmul %3, %4, %cst {dimension_numbers = #tpu.dot_dimension_numbers<[1], [0], [0], [1], [0, 0, 1, 1], [], []>} : vector<8x128xf32>, vector<128x128xf32>, vector<8x128xf32> -> vector<8x128xf32>
    %c0_4 = arith.constant 0 : index
    %c0_5 = arith.constant 0 : index
    %6 = vector.load %arg4[%c0_4, %c0_5] : memref<1x128xf32, #tpu.memory_space<vmem>>, vector<1x128xf32>
    %7 = vector.broadcast %6 : vector<1x128xf32> to vector<8x128xf32>
    %8 = arith.addf %5, %7 : vector<8x128xf32>
    %cst_6 = arith.constant 0.000000e+00 : f32
    %9 = vector.broadcast %cst_6 : f32 to vector<8x128xf32>
    %10 = arith.maximumf %8, %9 : vector<8x128xf32>
    %c0_7 = arith.constant 0 : index
    %c0_8 = arith.constant 0 : index
    %11 = vector.load %arg10[%c0_7, %c0_8] : memref<8x128xf32, #tpu.memory_space<vmem>>, vector<8x128xf32>
    %c0_9 = arith.constant 0 : index
    %c0_10 = arith.constant 0 : index
    %12 = vector.load %arg5[%c0_9, %c0_10] : memref<128x128xf32, #tpu.memory_space<vmem>>, vector<128x128xf32>
    %cst_11 = arith.constant dense<0.000000e+00> : vector<8x128xf32>
    %13 = tpu.matmul %10, %12, %cst_11 {dimension_numbers = #tpu.dot_dimension_numbers<[1], [0], [0], [1], [0, 0, 1, 1], [], []>} : vector<8x128xf32>, vector<128x128xf32>, vector<8x128xf32> -> vector<8x128xf32>
    %14 = arith.addf %11, %13 : vector<8x128xf32>
    %c0_12 = arith.constant 0 : index
    %c0_13 = arith.constant 0 : index
    %15 = vector.load %arg10[%c0_12, %c0_13] : memref<8x128xf32, #tpu.memory_space<vmem>>, vector<8x128xf32>
    tpu.vector_store %arg10[%c0_12, %c0_13], %14 {strides = array<i32>} : memref<8x128xf32, #tpu.memory_space<vmem>>, vector<8x128xf32>,
    %c0_i32_14 = arith.constant 0 : i32
    %16 = arith.cmpi eq, %arg1, %c0_i32_14 : i32
    %17 = arith.extui %16 : i1 to i32
    %c0_i32_15 = arith.constant 0 : i32
    %18 = arith.cmpi ne, %17, %c0_i32_15 : i32
    scf.if %18 {
      %c0_16 = arith.constant 0 : index
      %c0_17 = arith.constant 0 : index
      %19 = vector.load %arg10[%c0_16, %c0_17] : memref<8x128xf32, #tpu.memory_space<vmem>>, vector<8x128xf32>
      %c0_18 = arith.constant 0 : index
      %c0_19 = arith.constant 0 : index
      %20 = vector.load %arg6[%c0_18, %c0_19] : memref<1x128xf32, #tpu.memory_space<vmem>>, vector<1x128xf32>
      %21 = vector.broadcast %20 : vector<1x128xf32> to vector<8x128xf32>
      %22 = arith.addf %19, %21 : vector<8x128xf32>
      %cst_20 = arith.constant dense<0.000000e+00> : vector<8xf32>
      %23 = vector.multi_reduction <add>, %22, %cst_20 [1] : vector<8x128xf32> to vector<8xf32>
      %24 = vector.shape_cast %23 : vector<8xf32> to vector<8x1xf32>
      %cst_21 = arith.constant 7.812500e-03 : f32
      %25 = vector.broadcast %cst_21 : f32 to vector<8x1xf32>
      %26 = arith.mulf %24, %25 : vector<8x1xf32>
      %27 = vector.broadcast %26 : vector<8x1xf32> to vector<8x128xf32>
      %28 = arith.subf %22, %27 : vector<8x128xf32>
      %29 = arith.mulf %28, %28 : vector<8x128xf32>
      %cst_22 = arith.constant dense<0.000000e+00> : vector<8xf32>
      %30 = vector.multi_reduction <add>, %29, %cst_22 [1] : vector<8x128xf32> to vector<8xf32>
      %31 = vector.shape_cast %30 : vector<8xf32> to vector<8x1xf32>
      %cst_23 = arith.constant 7.812500e-03 : f32
      %32 = vector.broadcast %cst_23 : f32 to vector<8x1xf32>
      %33 = arith.mulf %31, %32 : vector<8x1xf32>
      %cst_24 = arith.constant 9.99999974E-6 : f32
      %34 = vector.broadcast %cst_24 : f32 to vector<8x1xf32>
      %35 = arith.addf %33, %34 : vector<8x1xf32>
      %36 = math.rsqrt %35 : vector<8x1xf32>
      %37 = vector.broadcast %36 : vector<8x1xf32> to vector<8x128xf32>
      %38 = arith.mulf %28, %37 : vector<8x128xf32>
      %c0_25 = arith.constant 0 : index
      %c0_26 = arith.constant 0 : index
      %39 = vector.load %arg7[%c0_25, %c0_26] : memref<1x128xf32, #tpu.memory_space<vmem>>, vector<1x128xf32>
      %40 = vector.broadcast %39 : vector<1x128xf32> to vector<8x128xf32>
      %41 = arith.mulf %38, %40 : vector<8x128xf32>
      %c0_27 = arith.constant 0 : index
      %c0_28 = arith.constant 0 : index
      %42 = vector.load %arg8[%c0_27, %c0_28] : memref<1x128xf32, #tpu.memory_space<vmem>>, vector<1x128xf32>
      %43 = vector.broadcast %42 : vector<1x128xf32> to vector<8x128xf32>
      %44 = arith.addf %41, %43 : vector<8x128xf32>
      %c0_29 = arith.constant 0 : index
      %c0_30 = arith.constant 0 : index
      %45 = vector.load %arg9[%c0_29, %c0_30] : memref<8x128xf32, #tpu.memory_space<vmem>>, vector<8x128xf32>
      tpu.vector_store %arg9[%c0_29, %c0_30], %44 {strides = array<i32>} : memref<8x128xf32, #tpu.memory_space<vmem>>, vector<8x128xf32>,
    } else {
    }
    return
  }
  func.func @transform_0(%arg0: i32, %arg1: i32) -> (i32, i32) {
    %c0_i32 = arith.constant 0 : i32
    %c0_i32_0 = arith.constant 0 : i32
    return %arg0, %c0_i32 : i32, i32
  }
  func.func @transform_1(%arg0: i32, %arg1: i32) -> (i32, i32) {
    %c0_i32 = arith.constant 0 : i32
    %c0_i32_0 = arith.constant 0 : i32
    %c0_i32_1 = arith.constant 0 : i32
    return %c0_i32, %c0_i32_0 : i32, i32
  }
  func.func @transform_2(%arg0: i32, %arg1: i32) -> (i32, i32) {
    %c0_i32 = arith.constant 0 : i32
    %c0_i32_0 = arith.constant 0 : i32
    return %c0_i32, %arg1 : i32, i32
  }
  func.func @transform_3(%arg0: i32, %arg1: i32) -> (i32, i32) {
    %c0_i32 = arith.constant 0 : i32
    %c0_i32_0 = arith.constant 0 : i32
    %c0_i32_1 = arith.constant 0 : i32
    return %c0_i32, %c0_i32_0 : i32, i32
  }
  func.func @transform_4(%arg0: i32, %arg1: i32) -> (i32, i32) {
    %c0_i32 = arith.constant 0 : i32
    %c0_i32_0 = arith.constant 0 : i32
    %c0_i32_1 = arith.constant 0 : i32
    return %c0_i32, %c0_i32_0 : i32, i32
  }
  func.func @transform_5(%arg0: i32, %arg1: i32) -> (i32, i32) {
    %c0_i32 = arith.constant 0 : i32
    %c0_i32_0 = arith.constant 0 : i32
    %c0_i32_1 = arith.constant 0 : i32
    return %c0_i32, %c0_i32_0 : i32, i32
  }
  func.func @transform_6(%arg0: i32, %arg1: i32) -> (i32, i32) {
    %c0_i32 = arith.constant 0 : i32
    %c0_i32_0 = arith.constant 0 : i32
    %c0_i32_1 = arith.constant 0 : i32
    return %c0_i32, %c0_i32_0 : i32, i32
  }
  func.func @transform_7(%arg0: i32, %arg1: i32) -> (i32, i32) {
    %c0_i32 = arith.constant 0 : i32
    %c0_i32_0 = arith.constant 0 : i32
    return %arg0, %c0_i32 : i32, i32
  }
}

</mosaic_0001>

<bundles_post_ra>
// kernel: tpu_custom_call.1
= control target key start
LH: loop header
LB: loop body
LE: loop exit
PB: predicated region body
PF: predicated region fallthrough
CT: control target
= control target key end

     0   :  { %s1357_s0 = inlined_call_operand.hbm [shape: f32[16,128], index: 0, kind: input, shape index: {}]   ;;  %s1358_s1 = inlined_call_operand.hbm [shape: f32[128,128], index: 1, kind: input, shape index: {}]   ;;  %s1359_s2 = inlined_call_operand.vmem [shape: f32[1,128], index: 2, kind: input, shape index: {}]   ;;  %s1360_s3 = inlined_call_operand.hbm [shape: f32[128,128], index: 3, kind: input, shape index: {}]   ;;  %s1361_s4 = inlined_call_operand.vmem [shape: f32[1,128], index: 4, kind: input, shape index: {}]   ;;  %s1362_s5 = inlined_call_operand.vmem [shape: f32[1,128], index: 5, kind: input, shape index: {}]   ;;  %s1363_s6 = inlined_call_operand.vmem [shape: f32[1,128], index: 6, kind: input, shape index: {}]   ;;  %s1364_s7 = inlined_call_operand.hbm [shape: f32[16,128], index: 7, kind: output, shape index: {}]  }
   0x1   :  { %1369 = sst [smem:[#allocation14_spill]] %s1358_s1 }
   0x2   :  { %1370 = sst [smem:[#allocation15_spill]] %s1360_s3 }
   0x3   :  { %12 = vsyncpa [#allocation4], 0 }
   0x4   :  { %14 = vsyncpa [#allocation4 + $0x1], 0 }
   0x5   :  { %15 = vsyncpa [#allocation7], 0 }
   0x6   :  { %16 = vsyncpa [#allocation5], 0 }
   0x7   :  { %18 = vsyncpa [#allocation5 + $0x1], 0  ;;  %s1130_s24 = smov 0   ;;  %s1132_s25 = smov 0  }
   0x8   :  { %s1134_s26 = smov 0   ;;  %s1136_s27 = smov 0  }
   0x9   :  { %s1138_s28 = smov 0   ;;  %s1140_s29 = smov 0  }
   0xa LB: > { %s701_s30 = sadd.s32 4294967295, %s1080_s29   ;;  %s702_s8 = sadd.s32 4294967294, %s1080_s29   ;;  %s1080_s29 = sphi %s1140_s29, %s24_s29   ;;  %s1076_s28 = sphi %s1138_s28, %s1391_s28   ;;  %s1072_s27 = sphi %s1136_s27, %s1390_s27   ;;  %s1068_s26 = sphi %s1134_s26, %s1389_s26   ;;  %s1064_s25 = sphi %s1132_s25, %s1388_s25   ;;  %s1060_s24 = sphi %s1130_s24, %s1387_s24  }
   0xb   : > { %p56_p0 = scmp.ne.s32.totalorder %s1064_s25, %s1060_s24  ;;  %p1164_p1 = scmp.eq.s32.totalorder %s701_s30, 0 }
   0xc   : > { %p1168_p2 = scmp.eq.s32.totalorder %s701_s30, 1  ;;  %p217_p3 = scmp.eq.s32.totalorder %s702_s8, 1 }
   0xd   : > { %s1371_s9 = scalar_select %p1164_p1, 1, 0 }
   0xe   : > { %p1174_p4 = por %p1164_p1, %p56_p0  ;;  %p703_p5 = scmp.ge.s32.totalorder %s1080_s29, 1 }
   0xf   : > { %p1179_p6 = por %p217_p3, %p56_p0  ;;  %p224_p7 = scmp.lt.s32.totalorder %s1080_s29, 3 }
  0x10   : > { %s1373_s11 = scalar_select %p1174_p4, 1, 0 }
  0x11   : > { %s1374_s12 = scalar_select %p1179_p6, 1, 0 }
  0x12   : > { %p1184_p8 = pnand %p703_p5, %p224_p7  ;;  %s1082_s14 = smov [#allocation6]  }
  0x13   : > { %s236_s15 = sshll.u32 %s1082_s14, 4  ;;  %s1083_s17 = smov [#allocation8]   ;;  %s237_s15 = int_to_ptr.vmem [resolvable:$true] %s236_s15 }
  0x14   : > { %p839_p9 = pneg %p1184_p8  ;;  %s255_s18 = sshll.u32 %s1083_s17, 4  ;;  %s256_s18 = int_to_ptr.vmem [resolvable:$true] %s255_s18 }
  0x15   : > { %s927_s19 = scalar_lea.vmem %s237_s15, 2048  ;;  %p935_p5 = scmp.lt.s32.totalorder %s237_s15, %s237_s15 }
  0x16   : > { %p1193_p11 = pnand %p839_p9, %p1164_p1  ;;  %p928_p13 = scmp.ne.s32.totalorder %s237_s15, %s927_s19 }
  0x17   : > { %p936_p7 = scmp.lt.s32.totalorder %s927_s19, %s927_s19 }
  0x18   : > { %p918_p12 = pneg %p1193_p11 }
  0x19   : > { %p937_p10 = por %p936_p7, %p935_p5 }
  0x1a   : > { %p930_p0 = pnand %p928_p13, %p918_p12 }
  0x1c   : > { %p931_p3 = pneg %p930_p0 }
  0x1e   : > { %p938_p9 = pnand %p937_p10, %p931_p3 }
  0x20   : > { %941 = shalt.err (!%p938_p9)
}
  0x21   : > { %s1084_s20 = smov 128   ;;  %s1085_s21 = smov 8  }
  0x22   : > { %s1377_s1 = sld [smem:[#allocation14_spill]]  ;;  %s953_s30 = scalar_lea.vmem %s256_s18, 2048 }
  0x23   : > { %p954_p6 = scmp.ne.s32.totalorder %s256_s18, %s953_s30  ;;  %p961_p1 = scmp.lt.s32.totalorder %s256_s18, %s256_s18 }
  0x24   : > { %p962_p4 = scmp.lt.s32.totalorder %s953_s30, %s953_s30 }
  0x25   : > { %p956_p13 = pnand %p954_p6, %p918_p12 }
  0x26   : > { %p963_p5 = por %p962_p4, %p961_p1 }
  0x27   : > { %p957_p0 = pneg %p956_p13 }
  0x28   : > { %842 = dma.hbm_to_vmem [thread:$0]  (!%p1193_p11), %s1377_s1, 2048, %s237_s15, [#allocation7], %s1084_s20, %s1084_s20, %s1085_s21  }
  0x29   : > { %p964_p10 = pnand %p963_p5, %p957_p0 }
  0x2b   : > { %967 = shalt.err (!%p964_p10)
}
  0x2c   : > { %s1378_s3 = sld [smem:[#allocation15_spill]]  ;;  %s36_s15 = sadd.s32 1, %s1076_s28 }
  0x2d   : > { %s43_s17 = sadd.s32 1, %s1068_s26  ;;  %p38_p1 = scmp.ge.s32.totalorder %s36_s15, 2 }
  0x2e   : > { %p50_p4 = scmp.ne.s32.totalorder %s1068_s26, %s1064_s25  ;;  %p51_p6 = scmp.eq.s32.totalorder %s1080_s29, 0 }
  0x2f   : > { %p856_p12 = scmp.lt.s32.totalorder %s1080_s29, 2  ;;  %s1393_s15 = smov (%p38_p1, %s36_s15), 0 }
  0x30   : > { %1379 = sst [smem:[#allocation13_spill]] %s1393_s15  ;;  %p52_p3 = por %p51_p6, %p50_p4 }
  0x31   : > { %p1225_p7 = por %p1168_p2, %p50_p4  ;;  %s40_s19 = ssub.s32 %s1076_s28, %s1393_s15 }
  0x32   : > { %845 = dma.hbm_to_vmem [thread:$0]  (!%p1193_p11), %s1378_s3, 2048, %s256_s18, [#allocation7], %s1084_s20, %s1084_s20, %s1085_s21  }
  0x33   : > { %s278_s22 = sand.u32 1, %s1068_s26   ;;  %p41_p9 = scmp.eq.s32.totalorder %s40_s19, 0 }
  0x34   : > { %s708_s18 = sshll.u32 %s278_s22, 3  ;;  %s709_s20 = sshll.u32 %s1076_s28, 7 }
  0x35   : > { %s1234_s21 = scalar_select %p41_p9, %s1068_s26, %s43_s17  }
  0x36   : > { %s287_s8 = scalar_lea.hbm %s1357_s0, %s709_s20  ;;  %s282_s14 = scalar_lea.vmem [#allocation3], %s708_s18 }
  0x37   : > { %s289_s1 = sshll.u32 %s282_s14, 4  ;;  %p1241_p11 = pnand %p856_p12, %p52_p3  ;;  %s290_s1 = int_to_ptr.vmem [resolvable:$true] %s289_s1 }
  0x38   : > { %s279_s3 = scalar_lea.sflag [#allocation4], %s278_s22  ;;  %s981_s19 = scalar_lea.vmem %s290_s1, 128 }
  0x39   : > { %p970_p2 = pneg %p1241_p11  ;;  %p982_p13 = scmp.ne.s32.totalorder %s290_s1, %s981_s19 }
  0x3a   : > { %s1086_s17 = smov [#allocation3]  }
  0x3b   : > { %p984_p0 = pnand %p982_p13, %p970_p2  ;;  %s986_s15 = sshll.u32 %s1086_s17, 4  ;;  %s987_s15 = int_to_ptr.vmem [resolvable:$false] %s986_s15 }
  0x3c   : > { %s988_s20 = scalar_lea.vmem %s987_s15, 256  ;;  %p989_p10 = scmp.lt.s32.totalorder %s290_s1, %s987_s15 }
  0x3d   : > { %p985_p5 = pneg %p984_p0  ;;  %p990_p1 = scmp.lt.s32.totalorder %s988_s20, %s981_s19 }
  0x3f   : > { %p991_p4 = por %p990_p1, %p989_p10 }
  0x41   : > { %p992_p6 = pnand %p991_p4, %p985_p5 }
  0x43   : > { %995 = shalt.err (!%p992_p6)
}
  0x44   : > { %849 = dma.hbm_to_vmem [thread:$0]  (!%p1241_p11), %s287_s8, 128, %s290_s1, %s279_s3  }
  0x45   : > { %298 = sbr.rel (%p1184_p8) target bundleno = 823 (0x337), region = 48  ;;  %s1252_s22 = sand.u32 (!%p1184_p8), 1, %s1064_s25  }
  0x46   : > { %s711_s18 = sshll.u32 (!%p1184_p8), %s1252_s22, 3  ;;  %s301_s23 = scalar_lea.sflag (!%p1184_p8), [#allocation4], %s1252_s22 }
  0x47   : > { %s1258_s15 = scalar_lea.vmem (!%p1184_p8), [#allocation3], %s711_s18  ;;  %p1382_p12 = scmp.ne.s32.totalorder (!%p1184_p8), %s1373_s11, 0 }
  0x4a   : > { %1047 = dma.done.wait (%p1382_p12), %s301_s23, 128  }
  0x4b   : > { %1049 = vsyncadd (%p1382_p12), %s301_s23, 4294967168  ;;  %p1383_p3 = scmp.ne.s32.totalorder %s1371_s9, 0 }
  0x4d   : > { %1051 = dma.done.wait (%p1383_p3), [#allocation7], 4096  }
  0x4e   : > { %1053 = vsyncadd (%p1383_p3), [#allocation7], 4294963200  ;;  %v1087_v0 = vmov 0.0   ;;  %vm1088_vm0 = vmmov 0   ;;  %v370_v1 = vld [vmem:[#allocation6 + $0x78] sm:$0xff]  ;;  %v369_v2 = vld [vmem:[#allocation6 + $0x70] sm:$0xff] }
  0x4f   : > { %757 = vmatprep.subr.mxu0 %v1087_v0  ;;  %789 = vmatprep.mubr.msk.f32.mxu0 %vm1088_vm0, %v1087_v0  ;;  %v368_v3 = vld [vmem:[#allocation6 + $0x68] sm:$0xff]  ;;  %v367_v4 = vld [vmem:[#allocation6 + $0x60] sm:$0xff]  ;;  %v465_v5 = vld [vmem:[#allocation8 + $0x78] sm:$0xff]  ;;  %s720_s10 = sshll.u32 %s1072_s27, 7  ;;  %s345_s19 = scalar_lea.vmem [#allocation9], %s711_s18 }
  0x50   : > { %792 = vmatprep.subr.mxu1 %v1087_v0  ;;  %824 = vmatprep.mubr.msk.f32.mxu1 %vm1088_vm0, %v1087_v0  ;;  %v366_v6 = vld [vmem:[#allocation6 + $0x58] sm:$0xff]  ;;  %v464_v7 = vld [vmem:[#allocation8 + $0x70] sm:$0xff]  ;;  %v463_v8 = vld [vmem:[#allocation8 + $0x68] sm:$0xff]  ;;  %s592_s17 = sshll.u32 %s345_s19, 4  ;;  %s579_s1 = scalar_lea.sflag [#allocation5], %s1252_s22  ;;  %s593_s17 = int_to_ptr.vmem [resolvable:$true] %s592_s17 }
  0x51   : > { %758 = vmatpush3.msra.mxu0 %v370_v1  ;;  %793 = vmatpush3.msra.mxu1 %v465_v5  ;;  %v365_v9 = vld [vmem:[#allocation6 + $0x50] sm:$0xff]  ;;  %v462_v10 = vld [vmem:[#allocation8 + $0x60] sm:$0xff]  ;;  %v364_v11 = vld [vmem:[#allocation6 + $0x48] sm:$0xff]  ;;  %s996_s3 = scalar_lea.vmem %s593_s17, 128  ;;  %s1089_s9 = smov [#allocation9]  }
  0x52   : > { %759 = vmatprep.subr.mxu0 %v1087_v0  ;;  %794 = vmatprep.subr.mxu1 %v1087_v0  ;;  %v461_v12 = vld [vmem:[#allocation8 + $0x58] sm:$0xff]  ;;  %v363_v13 = vld [vmem:[#allocation6 + $0x40] sm:$0xff]  ;;  %v460_v14 = vld [vmem:[#allocation8 + $0x50] sm:$0xff]  ;;  %p997_p8 = scmp.ne.s32.totalorder %s593_s17, %s996_s3  ;;  %s1000_s11 = sshll.u32 %s1089_s9, 4  ;;  %s1001_s11 = int_to_ptr.vmem [resolvable:$false] %s1000_s11 }
  0x53   : > { %760 = vmatpush3.msra.mxu0 %v369_v2  ;;  %795 = vmatpush3.msra.mxu1 %v464_v7  ;;  %v362_v15 = vld [vmem:[#allocation6 + $0x38] sm:$0xff]  ;;  %v459_v16 = vld [vmem:[#allocation8 + $0x48] sm:$0xff]  ;;  %v361_v17 = vld [vmem:[#allocation6 + $0x30] sm:$0xff]  ;;  %s1002_s27 = scalar_lea.vmem %s1001_s11, 256  ;;  %p1003_p2 = scmp.lt.s32.totalorder %s593_s17, %s1001_s11 }
  0x54   : > { %761 = vmatprep.subr.mxu0 %v1087_v0  ;;  %796 = vmatprep.subr.mxu1 %v1087_v0  ;;  %v458_v18 = vld [vmem:[#allocation8 + $0x40] sm:$0xff]  ;;  %v360_v19 = vld [vmem:[#allocation6 + $0x28] sm:$0xff]  ;;  %v457_v20 = vld [vmem:[#allocation8 + $0x38] sm:$0xff]  ;;  %p998_p9 = pnand %p997_p8, %p1225_p7  ;;  %p1004_p13 = scmp.lt.s32.totalorder %s1002_s27, %s996_s3 }
  0x55   : > { %762 = vmatpush3.msra.mxu0 %v368_v3  ;;  %797 = vmatpush3.msra.mxu1 %v463_v8  ;;  %v359_v21 = vld [vmem:[#allocation6 + $0x20] sm:$0xff]  ;;  %v456_v22 = vld [vmem:[#allocation8 + $0x30] sm:$0xff]  ;;  %v358_v23 = vld [vmem:[#allocation6 + $0x18] sm:$0xff] }
  0x56   : > { %763 = vmatprep.subr.mxu0 %v1087_v0  ;;  %798 = vmatprep.subr.mxu1 %v1087_v0  ;;  %v455_v24 = vld [vmem:[#allocation8 + $0x28] sm:$0xff]  ;;  %v357_v25 = vld [vmem:[#allocation6 + $0x10] sm:$0xff]  ;;  %v454_v26 = vld [vmem:[#allocation8 + $0x20] sm:$0xff]  ;;  %p999_p11 = pneg %p998_p9  ;;  %p1005_p0 = por %p1004_p13, %p1003_p2 }
  0x57   : > { %764 = vmatpush3.msra.mxu0 %v367_v4  ;;  %799 = vmatpush3.msra.mxu1 %v462_v10  ;;  %v356_v27 = vld [vmem:[#allocation6 + $0x8] sm:$0xff]  ;;  %v453_v28 = vld [vmem:[#allocation8 + $0x18] sm:$0xff]  ;;  %v355_v29 = vld [vmem:[#allocation6] sm:$0xff] }
  0x58   : > { %765 = vmatprep.subr.mxu0 %v1087_v0  ;;  %800 = vmatprep.subr.mxu1 %v1087_v0  ;;  %v354_v30 = vld [vmem:[%s1258_s15] sm:$0xff]  ;;  %v451_v32 = vld [vmem:[#allocation8 + $0x8] sm:$0xff]  ;;  %v450_v33 = vld [vmem:[#allocation8] sm:$0xff]  ;;  %s590_s15 = scalar_lea.hbm %s1364_s7, %s720_s10  ;;  %p1006_p5 = pnand %p1005_p0, %p999_p11 }
  0x59   : > { %766 = vmatpush3.msra.mxu0 %v366_v6  ;;  %801 = vmatpush3.msra.mxu1 %v461_v12  ;;  %v452_v31 = vld [vmem:[#allocation8 + $0x10] sm:$0xff] }
  0x5a   : > { %767 = vmatprep.subr.mxu0 %v1087_v0  ;;  %802 = vmatprep.subr.mxu1 %v1087_v0  ;;  %v715_v34 = vld [vmem:[%s1359_s2] ss:$0 sm:$0xff] }
  0x5b   : > { %768 = vmatpush3.msra.mxu0 %v365_v9  ;;  %803 = vmatpush3.msra.mxu1 %v460_v14  ;;  %v716_v39 = vld [vmem:[%s1361_s4] ss:$0 sm:$0xff] }
  0x5c   : > { %769 = vmatprep.subr.mxu0 %v1087_v0  ;;  %804 = vmatprep.subr.mxu1 %v1087_v0  ;;  %v717_v51 = vld [vmem:[%s1362_s5] ss:$0 sm:$0xff] }
  0x5d   : > { %770 = vmatpush3.msra.mxu0 %v364_v11  ;;  %805 = vmatpush3.msra.mxu1 %v459_v16  ;;  %v718_v53 = vld [vmem:[%s1363_s6] ss:$0 sm:$0xff] }
  0x5e   : > { %771 = vmatprep.subr.mxu0 %v1087_v0  ;;  %806 = vmatprep.subr.mxu1 %v1087_v0 }
  0x5f   : > { %772 = vmatpush3.msra.mxu0 %v363_v13  ;;  %807 = vmatpush3.msra.mxu1 %v458_v18 }
  0x60   : > { %773 = vmatprep.subr.mxu0 %v1087_v0  ;;  %808 = vmatprep.subr.mxu1 %v1087_v0 }
  0x61   : > { %774 = vmatpush3.msra.mxu0 %v362_v15  ;;  %809 = vmatpush3.msra.mxu1 %v457_v20 }
  0x62   : > { %775 = vmatprep.subr.mxu0 %v1087_v0  ;;  %810 = vmatprep.subr.mxu1 %v1087_v0 }
  0x63   : > { %776 = vmatpush3.msra.mxu0 %v361_v17  ;;  %811 = vmatpush3.msra.mxu1 %v456_v22 }
  0x64   : > { %777 = vmatprep.subr.mxu0 %v1087_v0  ;;  %812 = vmatprep.subr.mxu1 %v1087_v0 }
  0x65   : > { %778 = vmatpush3.msra.mxu0 %v360_v19  ;;  %813 = vmatpush3.msra.mxu1 %v455_v24 }
  0x66   : > { %779 = vmatprep.subr.mxu0 %v1087_v0  ;;  %814 = vmatprep.subr.mxu1 %v1087_v0 }
  0x67   : > { %780 = vmatpush3.msra.mxu0 %v359_v21  ;;  %815 = vmatpush3.msra.mxu1 %v454_v26 }
  0x68   : > { %781 = vmatprep.subr.mxu0 %v1087_v0  ;;  %816 = vmatprep.subr.mxu1 %v1087_v0 }
  0x69   : > { %782 = vmatpush3.msra.mxu0 %v358_v23  ;;  %817 = vmatpush3.msra.mxu1 %v453_v28 }
  0x6a   : > { %783 = vmatprep.subr.mxu0 %v1087_v0  ;;  %818 = vmatprep.subr.mxu1 %v1087_v0 }
  0x6b   : > { %784 = vmatpush3.msra.mxu0 %v357_v25  ;;  %819 = vmatpush3.msra.mxu1 %v452_v31 }
  0x6c   : > { %785 = vmatprep.subr.mxu0 %v1087_v0  ;;  %820 = vmatprep.subr.mxu1 %v1087_v0 }
  0x6d   : > { %786 = vmatpush3.msra.mxu0 %v356_v27  ;;  %821 = vmatpush3.msra.mxu1 %v451_v32 }
  0x6e   : > { %787 = vmatprep.subr.mxu0 %v1087_v0  ;;  %822 = vmatprep.subr.mxu1 %v1087_v0 }
  0x6f   : > { %788 = vmatpush3.msra.mxu0 %v355_v29  ;;  %823 = vmatpush3.msra.mxu1 %v450_v33 }
  0x70   : > { %790 = vmatmul.mubr.f32.vlgmr.msra.gmra.mxu0 %v354_v30 }
 0x130   : > { %v444_v35 = vpop.f32.mrf.mxu0 }
 0x131   : > { %v445_v36 = vadd.f32 %v715_v34, %v444_v35 }
 0x132   : > { %v791_v37 = vpop.f32.mrf.mxu0 }
 0x133   : > { %v448_v38 = vmax.f32 %v445_v36, 0.0 }
 0x135   : > { %825 = vmatmul.mubr.f32.vlgmr.msra.gmra.mxu1 %v448_v38 }
 0x1f5   : > { %v532_v40 = vpop.f32.mrf.mxu1 }
 0x1f6   : > { %v549_v41 = vadd.f32 %v716_v39, %v532_v40 }
 0x1f7   : > { %v826_v42 = vpop.f32.mrf.mxu1 }
 0x1f8   : > { %550 = vadd.xlane.f32.xlu0 %v549_v41 }
 0x281   : > { %v551_v43 = vpop.xlane.xlu0 %550 }
 0x282   : > { %v552_v44 = vmul.f32 0.0078125, %v551_v43 }
 0x284   : > { %v553_v45 = vsub.f32 %v549_v41, %v552_v44 }
 0x286   : > { %v554_v46 = vmul.f32 %v553_v45, %v553_v45 }
 0x288   : > { %555 = vadd.xlane.f32.xlu0 %v554_v46 }
 0x311   : > { %v556_v47 = vpop.xlane.xlu0 %555 }
 0x312   : > { %v557_v48 = vmul.f32 0.0078125, %v556_v47 }
 0x314   : > { %v558_v49 = vadd.f32 1e-05, %v557_v48 }
 0x316   : > { %914 = vrsqrt.f32 %v558_v49 }
 0x323   : > { %v915_v50 = vpop.eup %914 }
 0x324   : > { %v560_v52 = vmul.f32 %v915_v50, %v553_v45 }
 0x326   : > { %v568_v54 = vmul.f32 %v717_v51, %v560_v52 }
 0x328   : > { %v576_v55 = vadd.f32 %v718_v53, %v568_v54 }
 0x32a   : > { %577 = vst [vmem:[%s345_s19] sm:$0xff] %v576_v55 }
 0x32b   : > { %1009 = shalt.err (!%p1006_p5)
}
 0x32c   : > { %s1010_s18 = scalar_lea.hbm %s590_s15, 128  ;;  %s1014_s30 = scalar_lea.hbm %s1364_s7, 256 }
 0x32d   : > { %p1011_p10 = scmp.ne.s32.totalorder %s590_s15, %s1010_s18  ;;  %p1015_p6 = scmp.lt.s32.totalorder %s590_s15, %s1364_s7 }
 0x32e   : > { %p1016_p12 = scmp.lt.s32.totalorder %s1014_s30, %s1010_s18 }
 0x32f   : > { %p1012_p1 = pnand %p1011_p10, %p1225_p7 }
 0x330   : > { %p1017_p3 = por %p1016_p12, %p1015_p6 }
 0x331   : > { %p1013_p4 = pneg %p1012_p1 }
 0x333   : > { %p1018_p8 = pnand %p1017_p3, %p1013_p4 }
 0x335   : > { %1021 = shalt.err (!%p1018_p8)
}
 0x336   : > { %837 = dma.vmem_to_hbm [thread:$0]  (%p1225_p7), %s593_s17, 128, %s590_s15, %s579_s1  }
 0x337 PF: > { %s604_s10 = sand.u32 1, %s1060_s24   ;;  %p1384_p9 = scmp.ne.s32.totalorder %s1374_s12, 0 }
 0x338   : > { %p1385_p11 = scmp.ge.s32.totalorder %s1080_s29, 2  ;;  %s605_s19 = scalar_lea.sflag [#allocation5], %s604_s10 }
 0x33a   : > { %p851_p2 = pnand %p1385_p11, %p1384_p9 }
 0x33c   : > { %p852_p13 = pneg %p851_p2 }
 0x33e   : > { %1055 = dma.done.wait (%p852_p13), %s605_s19, 128  }
 0x33f   : > { %1057 = vsyncadd (%p852_p13), %s605_s19, 4294967168  ;;  %s24_s29 = sadd.s32 1, %s1080_s29   ;;  %s1386_s16 = sld [smem:[#allocation13_spill]] }
 0x340   : > { %p21_p0 = scmp.ge.s32.totalorder %s24_s29, 4   ;;  %s1387_s24 = smov %s1064_s25 }
 0x341   : > { %s1388_s25 = smov %s1068_s26  ;;  %s1389_s26 = smov %s1234_s21 }
 0x342   : > { %s1390_s27 = smov %s1076_s28  ;;  %23 = sbr.rel (!%p21_p0) target bundleno = 10 (0xa), region = 112 }
 0x345   : > { %s1391_s28 = smov %s1386_s16 }
 0x347   :  { %610 = vsyncpa [#allocation4], 1 }
 0x348   :  { %612 = vsyncpa [#allocation4 + $0x1], 1 }
 0x349   :  { %613 = vsyncpa [#allocation7], 1 }
 0x34a   :  { %614 = vsyncpa [#allocation5], 1 }
 0x34b   :  { %616 = vsyncpa [#allocation5 + $0x1], 1 }

</bundles_post_ra>
